<compile_context>
chip_gen: v6e
topology: v6e:2x2x1
jax: 0.10.0
libtpu: 0.0.40
codegen_flags: <defaults>
</compile_context>

<pallas_src>
import jax
import jax.numpy as jnp
from jax.experimental import pallas as pl
from jax.experimental.pallas import tpu as pltpu

NUM_GATES = 4   # PyTorch LSTM gate order: [i, f, g, o]
LANE_PAD = 128  # lane-dense output tile width


def _tree_sum(terms):
    """Balanced add tree over a list of same-shaped arrays (shortens VPU dep chain)."""
    while len(terms) > 1:
        nxt = [terms[a] + terms[a + 1] for a in range(0, len(terms) - 1, 2)]
        if len(terms) % 2:
            nxt.append(terms[-1])
        terms = nxt
    return terms[0]


def lstm_fc_kernel(x_ref, w_ih_ref, w_hh_ref, b_ref, w_fc_ref, b_fc_ref, out_ref):
    # x_ref    : [B, T]      lane-dense input sequence (input_size == 1)
    # w_ih_ref : [1, 4H]     packed input->gate weights  (columns: [i | f | g | o])
    # w_hh_ref : [H, 4H]     packed hidden->gate weights
    # b_ref    : [1, 4H]     packed bias (b_ih + b_hh)
    # w_fc_ref : [1, H]      fc.weight
    # b_fc_ref : [1, 1]      fc.bias
    # out_ref  : [B, LANE_PAD]  lane-dense output; wrapper slices [:, :1]
    B, T = x_ref.shape
    H = w_hh_ref.shape[0]
    G = NUM_GATES * H  # packed gate width (16)

    # ---- hoisted, loop-invariant values (computed once, not per step) ----------
    x = x_ref[...]                                            # [B, T]  one vreg
    w_ih_b = jnp.broadcast_to(w_ih_ref[...], (B, G))          # [B, 4H]
    b_b = jnp.broadcast_to(b_ref[...], (B, G))                # [B, 4H]
    w_hh = w_hh_ref[...]                                      # [H, 4H]
    w_hh_rows = [jnp.broadcast_to(w_hh[k:k + 1, :], (B, G)) for k in range(H)]

    # Lane mask over the packed gate vector: True on the g-gate lanes (plain tanh),
    # False on i/f/o lanes (sigmoid via 0.5*(1 + tanh(x/2))).
    lane = jax.lax.broadcasted_iota(jnp.int32, (B, G), 1)
    is_g = (lane >= 2 * H) & (lane < 3 * H)
    mult = jnp.where(is_g, 1.0, 0.5).astype(jnp.float32)      # pre-scale & post-scale
    off = jnp.where(is_g, 0.0, 0.5).astype(jnp.float32)       # post-offset

    # ---- recurrence, fully unrolled (T is compile-time static) -----------------
    h = jnp.zeros((B, H), jnp.float32)
    c = jnp.zeros((B, H), jnp.float32)
    for t in range(T):
        # Input projection for step t (I == 1 -> outer product); no h/c dependence,
        # so it overlaps with the previous step's EUP latency.
        xw_t = x[:, t:t + 1] * w_ih_b + b_b                    # [B, 4H]

        # Packed recurrent contraction h @ W_hh: 4 lane-broadcasts, 4 muls, 3 adds.
        pre = xw_t + _tree_sum([h[:, k:k + 1] * w_hh_rows[k] for k in range(H)])

        # All four gate activations in ONE EUP push:
        #   i/f/o lanes: sigmoid(x) = 0.5 * (1 + tanh(x / 2));  g lanes: tanh(x).
        t_act = jnp.tanh(pre * mult)
        acts = t_act * mult + off                               # [B, 4H]

        i_g = acts[:, 0:H]
        f_g = acts[:, H:2 * H]
        g_g = acts[:, 2 * H:3 * H]
        o_g = acts[:, 3 * H:4 * H]

        c = f_g * c + i_g * g_g
        h = o_g * jnp.tanh(c)                                   # 2nd (last) EUP push

    # fc head on the last hidden state: VPU mul + lane reduction (no MXU).
    y = jnp.sum(h * w_fc_ref[...], axis=-1, keepdims=True) + b_fc_ref[...]  # [B, 1]
    # Lane-dense store; wrapper slices column 0.
    out_ref[...] = jnp.broadcast_to(y, out_ref.shape)


def lstm_forward(x, params):
    """x: [B, T, 1] float32 (batch_first, like the PyTorch module). Returns [B, 1]."""
    w_ih_pk, w_hh_pk, b_pk, w_fc, b_fc = params
    B, T, I = x.shape
    assert I == 1, "kernel is specialized to the module default input_size=1"
    # Lane-dense sequence: one vreg / one vld for the whole input instead of a
    # (8,128)-padded tile per timestep.
    x_bt = x.astype(jnp.float32).reshape(B, T)

    vmem = pl.BlockSpec(memory_space=pltpu.MemorySpace.VMEM)
    out_padded = pl.pallas_call(
        lstm_fc_kernel,
        out_shape=jax.ShapeDtypeStruct((B, LANE_PAD), jnp.float32),
        in_specs=[vmem] * 6,
        out_specs=vmem,
    )(x_bt, w_ih_pk, w_hh_pk, b_pk, w_fc, b_fc)
    # NOTE: if T or B is ever scaled up (esp. on v7x's 64 MiB VMEM), tile the
    # sequence with a grid over T (dimension_semantics=("arbitrary",), h/c carried
    # in VMEM scratch) and split batch over a "parallel" axis; at these module
    # shapes everything fits in a single VMEM-resident call.
    return out_padded[:, :1]


def init_params(key, input_size=1, hidden_size=4):
    """Deterministic init mimicking PyTorch's U(-1/sqrt(H), 1/sqrt(H)), converted
    to the packed, transposed layout the kernel expects."""
    H, I = hidden_size, input_size
    k = 1.0 / jnp.sqrt(jnp.float32(H))
    keys = jax.random.split(key, 6)
    w_ih = jax.random.uniform(keys[0], (4 * H, I), jnp.float32, -k, k)   # weight_ih_l0
    w_hh = jax.random.uniform(keys[1], (4 * H, H), jnp.float32, -k, k)   # weight_hh_l0
    b_ih = jax.random.uniform(keys[2], (4 * H,), jnp.float32, -k, k)     # bias_ih_l0
    b_hh = jax.random.uniform(keys[3], (4 * H,), jnp.float32, -k, k)     # bias_hh_l0
    w_fc = jax.random.uniform(keys[4], (1, H), jnp.float32, -k, k)       # fc.weight
    b_fc = jax.random.uniform(keys[5], (1,), jnp.float32, -k, k)         # fc.bias

    w_ih_pk = w_ih.T                                  # [I, 4H], cols [i | f | g | o]
    w_hh_pk = w_hh.T                                  # [H, 4H]
    b_pk = (b_ih + b_hh).reshape(1, 4 * H)            # [1, 4H]
    return (w_ih_pk, w_hh_pk, b_pk, w_fc, b_fc.reshape(1, 1))


def lstm_reference(x, params):
    """Pure-JAX reference of the PyTorch forward for a correctness check."""
    w_ih_pk, w_hh_pk, b_pk, w_fc, b_fc = params
    B, T, I = x.shape
    H = w_hh_pk.shape[0]
    h = jnp.zeros((B, H), jnp.float32)
    c = jnp.zeros((B, H), jnp.float32)
    for t in range(T):
        x_t = x[:, t, :].astype(jnp.float32)
        pre = x_t @ w_ih_pk + h @ w_hh_pk + b_pk                 # [B, 4H]
        i_g = jax.nn.sigmoid(pre[:, 0:H])
        f_g = jax.nn.sigmoid(pre[:, H:2 * H])
        g_g = jnp.tanh(pre[:, 2 * H:3 * H])
        o_g = jax.nn.sigmoid(pre[:, 3 * H:4 * H])
        c = f_g * c + i_g * g_g
        h = o_g * jnp.tanh(c)
    return h @ w_fc.T + b_fc                                     # [B, 1]


if __name__ == "__main__":
    key = jax.random.PRNGKey(0)
    k_x, k_p = jax.random.split(key)

    B, T, I, H = 2, 8, 1, 4  # small shapes consistent with the module defaults
    x = jax.random.normal(k_x, (B, T, I), jnp.float32)
    params = init_params(k_p, input_size=I, hidden_size=H)

    out = lstm_forward(x, params)
    out = jax.block_until_ready(out)

    ref = lstm_reference(x, params)
    assert out.shape == (B, 1)
    # sigmoid-via-tanh differs from jax.nn.sigmoid by ~ulps; well within tolerance.
    assert jnp.allclose(out, ref, atol=1e-4, rtol=1e-4)

    print("KERNEL_OK")
</pallas_src>

<mosaic_0001>
module attributes {stable_mosaic.version = 11 : i64} {
  func.func @lstm_fc_kernel(%arg0: memref<2x8xf32, #tpu.memory_space<vmem>>, %arg1: memref<1x16xf32, #tpu.memory_space<vmem>>, %arg2: memref<4x16xf32, #tpu.memory_space<vmem>>, %arg3: memref<1x16xf32, #tpu.memory_space<vmem>>, %arg4: memref<1x4xf32, #tpu.memory_space<vmem>>, %arg5: memref<1x1xf32, #tpu.memory_space<vmem>>, %arg6: memref<2x128xf32, #tpu.memory_space<vmem>>) attributes {dimension_semantics = [], scalar_prefetch = 0 : i64, scratch_operands = 0 : i64, tpu.core_type = #tpu.core_type<tc>} {
    %c0 = arith.constant 0 : index
    %c0_0 = arith.constant 0 : index
    %0 = vector.load %arg0[%c0, %c0_0] : memref<2x8xf32, #tpu.memory_space<vmem>>, vector<2x8xf32>
    %c0_1 = arith.constant 0 : index
    %c0_2 = arith.constant 0 : index
    %1 = vector.load %arg1[%c0_1, %c0_2] : memref<1x16xf32, #tpu.memory_space<vmem>>, vector<1x16xf32>
    %2 = vector.shape_cast %1 : vector<1x16xf32> to vector<1x16xf32>
    %3 = vector.broadcast %2 : vector<1x16xf32> to vector<2x16xf32>
    %c0_3 = arith.constant 0 : index
    %c0_4 = arith.constant 0 : index
    %4 = vector.load %arg3[%c0_3, %c0_4] : memref<1x16xf32, #tpu.memory_space<vmem>>, vector<1x16xf32>
    %5 = vector.shape_cast %4 : vector<1x16xf32> to vector<1x16xf32>
    %6 = vector.broadcast %5 : vector<1x16xf32> to vector<2x16xf32>
    %c0_5 = arith.constant 0 : index
    %c0_6 = arith.constant 0 : index
    %7 = vector.load %arg2[%c0_5, %c0_6] : memref<4x16xf32, #tpu.memory_space<vmem>>, vector<4x16xf32>
    %8 = vector.extract_strided_slice %7 {offsets = [0, 0], sizes = [1, 16], strides = [1, 1]} : vector<4x16xf32> to vector<1x16xf32>
    %9 = vector.shape_cast %8 : vector<1x16xf32> to vector<1x16xf32>
    %10 = vector.broadcast %9 : vector<1x16xf32> to vector<2x16xf32>
    %11 = vector.extract_strided_slice %7 {offsets = [1, 0], sizes = [1, 16], strides = [1, 1]} : vector<4x16xf32> to vector<1x16xf32>
    %12 = vector.shape_cast %11 : vector<1x16xf32> to vector<1x16xf32>
    %13 = vector.broadcast %12 : vector<1x16xf32> to vector<2x16xf32>
    %14 = vector.extract_strided_slice %7 {offsets = [2, 0], sizes = [1, 16], strides = [1, 1]} : vector<4x16xf32> to vector<1x16xf32>
    %15 = vector.shape_cast %14 : vector<1x16xf32> to vector<1x16xf32>
    %16 = vector.broadcast %15 : vector<1x16xf32> to vector<2x16xf32>
    %17 = vector.extract_strided_slice %7 {offsets = [3, 0], sizes = [1, 16], strides = [1, 1]} : vector<4x16xf32> to vector<1x16xf32>
    %18 = vector.shape_cast %17 : vector<1x16xf32> to vector<1x16xf32>
    %19 = vector.broadcast %18 : vector<1x16xf32> to vector<2x16xf32>
    %20 = tpu.iota {dimensions = array<i32: 1>} : vector<2x16xi32>
    %c8_i32 = arith.constant 8 : i32
    %21 = vector.broadcast %c8_i32 : i32 to vector<2x16xi32>
    %22 = arith.cmpi sge, %20, %21 : vector<2x16xi32>
    %c12_i32 = arith.constant 12 : i32
    %23 = vector.broadcast %c12_i32 : i32 to vector<2x16xi32>
    %24 = arith.cmpi slt, %20, %23 : vector<2x16xi32>
    %25 = arith.andi %22, %24 : vector<2x16xi1>
    %cst = arith.constant 1.000000e+00 : f32
    %cst_7 = arith.constant 5.000000e-01 : f32
    %26 = vector.broadcast %cst : f32 to vector<2x16xf32>
    %27 = vector.broadcast %cst_7 : f32 to vector<2x16xf32>
    %28 = arith.select %25, %26, %27 : vector<2x16xi1>, vector<2x16xf32>
    %cst_8 = arith.constant 0.000000e+00 : f32
    %cst_9 = arith.constant 5.000000e-01 : f32
    %29 = vector.broadcast %cst_8 : f32 to vector<2x16xf32>
    %30 = vector.broadcast %cst_9 : f32 to vector<2x16xf32>
    %31 = arith.select %25, %29, %30 : vector<2x16xi1>, vector<2x16xf32>
    %cst_10 = arith.constant 0.000000e+00 : f32
    %32 = vector.broadcast %cst_10 : f32 to vector<2x4xf32>
    %cst_11 = arith.constant 0.000000e+00 : f32
    %33 = vector.broadcast %cst_11 : f32 to vector<2x4xf32>
    %34 = vector.extract_strided_slice %0 {offsets = [0, 0], sizes = [2, 1], strides = [1, 1]} : vector<2x8xf32> to vector<2x1xf32>
    %35 = vector.broadcast %34 : vector<2x1xf32> to vector<2x16xf32>
    %36 = arith.mulf %35, %3 : vector<2x16xf32>
    %37 = arith.addf %36, %6 : vector<2x16xf32>
    %38 = vector.extract_strided_slice %32 {offsets = [0, 0], sizes = [2, 1], strides = [1, 1]} : vector<2x4xf32> to vector<2x1xf32>
    %39 = vector.broadcast %38 : vector<2x1xf32> to vector<2x16xf32>
    %40 = arith.mulf %39, %10 : vector<2x16xf32>
    %41 = vector.extract_strided_slice %32 {offsets = [0, 1], sizes = [2, 1], strides = [1, 1]} : vector<2x4xf32> to vector<2x1xf32>
    %42 = vector.broadcast %41 : vector<2x1xf32> to vector<2x16xf32>
    %43 = arith.mulf %42, %13 : vector<2x16xf32>
    %44 = vector.extract_strided_slice %32 {offsets = [0, 2], sizes = [2, 1], strides = [1, 1]} : vector<2x4xf32> to vector<2x1xf32>
    %45 = vector.broadcast %44 : vector<2x1xf32> to vector<2x16xf32>
    %46 = arith.mulf %45, %16 : vector<2x16xf32>
    %47 = vector.extract_strided_slice %32 {offsets = [0, 3], sizes = [2, 1], strides = [1, 1]} : vector<2x4xf32> to vector<2x1xf32>
    %48 = vector.broadcast %47 : vector<2x1xf32> to vector<2x16xf32>
    %49 = arith.mulf %48, %19 : vector<2x16xf32>
    %50 = arith.addf %40, %43 : vector<2x16xf32>
    %51 = arith.addf %46, %49 : vector<2x16xf32>
    %52 = arith.addf %50, %51 : vector<2x16xf32>
    %53 = arith.addf %37, %52 : vector<2x16xf32>
    %54 = arith.mulf %53, %28 : vector<2x16xf32>
    %55 = math.tanh %54 : vector<2x16xf32>
    %56 = arith.mulf %55, %28 : vector<2x16xf32>
    %57 = arith.addf %56, %31 : vector<2x16xf32>
    %58 = vector.extract_strided_slice %57 {offsets = [0, 0], sizes = [2, 4], strides = [1, 1]} : vector<2x16xf32> to vector<2x4xf32>
    %59 = vector.extract_strided_slice %57 {offsets = [0, 4], sizes = [2, 4], strides = [1, 1]} : vector<2x16xf32> to vector<2x4xf32>
    %60 = vector.extract_strided_slice %57 {offsets = [0, 8], sizes = [2, 4], strides = [1, 1]} : vector<2x16xf32> to vector<2x4xf32>
    %61 = vector.extract_strided_slice %57 {offsets = [0, 12], sizes = [2, 4], strides = [1, 1]} : vector<2x16xf32> to vector<2x4xf32>
    %62 = arith.mulf %59, %33 : vector<2x4xf32>
    %63 = arith.mulf %58, %60 : vector<2x4xf32>
    %64 = arith.addf %62, %63 : vector<2x4xf32>
    %65 = math.tanh %64 : vector<2x4xf32>
    %66 = arith.mulf %61, %65 : vector<2x4xf32>
    %67 = vector.extract_strided_slice %0 {offsets = [0, 1], sizes = [2, 1], strides = [1, 1]} : vector<2x8xf32> to vector<2x1xf32>
    %68 = vector.broadcast %67 : vector<2x1xf32> to vector<2x16xf32>
    %69 = arith.mulf %68, %3 : vector<2x16xf32>
    %70 = arith.addf %69, %6 : vector<2x16xf32>
    %71 = vector.extract_strided_slice %66 {offsets = [0, 0], sizes = [2, 1], strides = [1, 1]} : vector<2x4xf32> to vector<2x1xf32>
    %72 = vector.broadcast %71 : vector<2x1xf32> to vector<2x16xf32>
    %73 = arith.mulf %72, %10 : vector<2x16xf32>
    %74 = vector.extract_strided_slice %66 {offsets = [0, 1], sizes = [2, 1], strides = [1, 1]} : vector<2x4xf32> to vector<2x1xf32>
    %75 = vector.broadcast %74 : vector<2x1xf32> to vector<2x16xf32>
    %76 = arith.mulf %75, %13 : vector<2x16xf32>
    %77 = vector.extract_strided_slice %66 {offsets = [0, 2], sizes = [2, 1], strides = [1, 1]} : vector<2x4xf32> to vector<2x1xf32>
    %78 = vector.broadcast %77 : vector<2x1xf32> to vector<2x16xf32>
    %79 = arith.mulf %78, %16 : vector<2x16xf32>
    %80 = vector.extract_strided_slice %66 {offsets = [0, 3], sizes = [2, 1], strides = [1, 1]} : vector<2x4xf32> to vector<2x1xf32>
    %81 = vector.broadcast %80 : vector<2x1xf32> to vector<2x16xf32>
    %82 = arith.mulf %81, %19 : vector<2x16xf32>
    %83 = arith.addf %73, %76 : vector<2x16xf32>
    %84 = arith.addf %79, %82 : vector<2x16xf32>
    %85 = arith.addf %83, %84 : vector<2x16xf32>
    %86 = arith.addf %70, %85 : vector<2x16xf32>
    %87 = arith.mulf %86, %28 : vector<2x16xf32>
    %88 = math.tanh %87 : vector<2x16xf32>
    %89 = arith.mulf %88, %28 : vector<2x16xf32>
    %90 = arith.addf %89, %31 : vector<2x16xf32>
    %91 = vector.extract_strided_slice %90 {offsets = [0, 0], sizes = [2, 4], strides = [1, 1]} : vector<2x16xf32> to vector<2x4xf32>
    %92 = vector.extract_strided_slice %90 {offsets = [0, 4], sizes = [2, 4], strides = [1, 1]} : vector<2x16xf32> to vector<2x4xf32>
    %93 = vector.extract_strided_slice %90 {offsets = [0, 8], sizes = [2, 4], strides = [1, 1]} : vector<2x16xf32> to vector<2x4xf32>
    %94 = vector.extract_strided_slice %90 {offsets = [0, 12], sizes = [2, 4], strides = [1, 1]} : vector<2x16xf32> to vector<2x4xf32>
    %95 = arith.mulf %92, %64 : vector<2x4xf32>
    %96 = arith.mulf %91, %93 : vector<2x4xf32>
    %97 = arith.addf %95, %96 : vector<2x4xf32>
    %98 = math.tanh %97 : vector<2x4xf32>
    %99 = arith.mulf %94, %98 : vector<2x4xf32>
    %100 = vector.extract_strided_slice %0 {offsets = [0, 2], sizes = [2, 1], strides = [1, 1]} : vector<2x8xf32> to vector<2x1xf32>
    %101 = vector.broadcast %100 : vector<2x1xf32> to vector<2x16xf32>
    %102 = arith.mulf %101, %3 : vector<2x16xf32>
    %103 = arith.addf %102, %6 : vector<2x16xf32>
    %104 = vector.extract_strided_slice %99 {offsets = [0, 0], sizes = [2, 1], strides = [1, 1]} : vector<2x4xf32> to vector<2x1xf32>
    %105 = vector.broadcast %104 : vector<2x1xf32> to vector<2x16xf32>
    %106 = arith.mulf %105, %10 : vector<2x16xf32>
    %107 = vector.extract_strided_slice %99 {offsets = [0, 1], sizes = [2, 1], strides = [1, 1]} : vector<2x4xf32> to vector<2x1xf32>
    %108 = vector.broadcast %107 : vector<2x1xf32> to vector<2x16xf32>
    %109 = arith.mulf %108, %13 : vector<2x16xf32>
    %110 = vector.extract_strided_slice %99 {offsets = [0, 2], sizes = [2, 1], strides = [1, 1]} : vector<2x4xf32> to vector<2x1xf32>
    %111 = vector.broadcast %110 : vector<2x1xf32> to vector<2x16xf32>
    %112 = arith.mulf %111, %16 : vector<2x16xf32>
    %113 = vector.extract_strided_slice %99 {offsets = [0, 3], sizes = [2, 1], strides = [1, 1]} : vector<2x4xf32> to vector<2x1xf32>
    %114 = vector.broadcast %113 : vector<2x1xf32> to vector<2x16xf32>
    %115 = arith.mulf %114, %19 : vector<2x16xf32>
    %116 = arith.addf %106, %109 : vector<2x16xf32>
    %117 = arith.addf %112, %115 : vector<2x16xf32>
    %118 = arith.addf %116, %117 : vector<2x16xf32>
    %119 = arith.addf %103, %118 : vector<2x16xf32>
    %120 = arith.mulf %119, %28 : vector<2x16xf32>
    %121 = math.tanh %120 : vector<2x16xf32>
    %122 = arith.mulf %121, %28 : vector<2x16xf32>
    %123 = arith.addf %122, %31 : vector<2x16xf32>
    %124 = vector.extract_strided_slice %123 {offsets = [0, 0], sizes = [2, 4], strides = [1, 1]} : vector<2x16xf32> to vector<2x4xf32>
    %125 = vector.extract_strided_slice %123 {offsets = [0, 4], sizes = [2, 4], strides = [1, 1]} : vector<2x16xf32> to vector<2x4xf32>
    %126 = vector.extract_strided_slice %123 {offsets = [0, 8], sizes = [2, 4], strides = [1, 1]} : vector<2x16xf32> to vector<2x4xf32>
    %127 = vector.extract_strided_slice %123 {offsets = [0, 12], sizes = [2, 4], strides = [1, 1]} : vector<2x16xf32> to vector<2x4xf32>
    %128 = arith.mulf %125, %97 : vector<2x4xf32>
    %129 = arith.mulf %124, %126 : vector<2x4xf32>
    %130 = arith.addf %128, %129 : vector<2x4xf32>
    %131 = math.tanh %130 : vector<2x4xf32>
    %132 = arith.mulf %127, %131 : vector<2x4xf32>
    %133 = vector.extract_strided_slice %0 {offsets = [0, 3], sizes = [2, 1], strides = [1, 1]} : vector<2x8xf32> to vector<2x1xf32>
    %134 = vector.broadcast %133 : vector<2x1xf32> to vector<2x16xf32>
    %135 = arith.mulf %134, %3 : vector<2x16xf32>
    %136 = arith.addf %135, %6 : vector<2x16xf32>
    %137 = vector.extract_strided_slice %132 {offsets = [0, 0], sizes = [2, 1], strides = [1, 1]} : vector<2x4xf32> to vector<2x1xf32>
    %138 = vector.broadcast %137 : vector<2x1xf32> to vector<2x16xf32>
    %139 = arith.mulf %138, %10 : vector<2x16xf32>
    %140 = vector.extract_strided_slice %132 {offsets = [0, 1], sizes = [2, 1], strides = [1, 1]} : vector<2x4xf32> to vector<2x1xf32>
    %141 = vector.broadcast %140 : vector<2x1xf32> to vector<2x16xf32>
    %142 = arith.mulf %141, %13 : vector<2x16xf32>
    %143 = vector.extract_strided_slice %132 {offsets = [0, 2], sizes = [2, 1], strides = [1, 1]} : vector<2x4xf32> to vector<2x1xf32>
    %144 = vector.broadcast %143 : vector<2x1xf32> to vector<2x16xf32>
    %145 = arith.mulf %144, %16 : vector<2x16xf32>
    %146 = vector.extract_strided_slice %132 {offsets = [0, 3], sizes = [2, 1], strides = [1, 1]} : vector<2x4xf32> to vector<2x1xf32>
    %147 = vector.broadcast %146 : vector<2x1xf32> to vector<2x16xf32>
    %148 = arith.mulf %147, %19 : vector<2x16xf32>
    %149 = arith.addf %139, %142 : vector<2x16xf32>
    %150 = arith.addf %145, %148 : vector<2x16xf32>
    %151 = arith.addf %149, %150 : vector<2x16xf32>
    %152 = arith.addf %136, %151 : vector<2x16xf32>
    %153 = arith.mulf %152, %28 : vector<2x16xf32>
    %154 = math.tanh %153 : vector<2x16xf32>
    %155 = arith.mulf %154, %28 : vector<2x16xf32>
    %156 = arith.addf %155, %31 : vector<2x16xf32>
    %157 = vector.extract_strided_slice %156 {offsets = [0, 0], sizes = [2, 4], strides = [1, 1]} : vector<2x16xf32> to vector<2x4xf32>
    %158 = vector.extract_strided_slice %156 {offsets = [0, 4], sizes = [2, 4], strides = [1, 1]} : vector<2x16xf32> to vector<2x4xf32>
    %159 = vector.extract_strided_slice %156 {offsets = [0, 8], sizes = [2, 4], strides = [1, 1]} : vector<2x16xf32> to vector<2x4xf32>
    %160 = vector.extract_strided_slice %156 {offsets = [0, 12], sizes = [2, 4], strides = [1, 1]} : vector<2x16xf32> to vector<2x4xf32>
    %161 = arith.mulf %158, %130 : vector<2x4xf32>
    %162 = arith.mulf %157, %159 : vector<2x4xf32>
    %163 = arith.addf %161, %162 : vector<2x4xf32>
    %164 = math.tanh %163 : vector<2x4xf32>
    %165 = arith.mulf %160, %164 : vector<2x4xf32>
    %166 = vector.extract_strided_slice %0 {offsets = [0, 4], sizes = [2, 1], strides = [1, 1]} : vector<2x8xf32> to vector<2x1xf32>
    %167 = vector.broadcast %166 : vector<2x1xf32> to vector<2x16xf32>
    %168 = arith.mulf %167, %3 : vector<2x16xf32>
    %169 = arith.addf %168, %6 : vector<2x16xf32>
    %170 = vector.extract_strided_slice %165 {offsets = [0, 0], sizes = [2, 1], strides = [1, 1]} : vector<2x4xf32> to vector<2x1xf32>
    %171 = vector.broadcast %170 : vector<2x1xf32> to vector<2x16xf32>
    %172 = arith.mulf %171, %10 : vector<2x16xf32>
    %173 = vector.extract_strided_slice %165 {offsets = [0, 1], sizes = [2, 1], strides = [1, 1]} : vector<2x4xf32> to vector<2x1xf32>
    %174 = vector.broadcast %173 : vector<2x1xf32> to vector<2x16xf32>
    %175 = arith.mulf %174, %13 : vector<2x16xf32>
    %176 = vector.extract_strided_slice %165 {offsets = [0, 2], sizes = [2, 1], strides = [1, 1]} : vector<2x4xf32> to vector<2x1xf32>
    %177 = vector.broadcast %176 : vector<2x1xf32> to vector<2x16xf32>
    %178 = arith.mulf %177, %16 : vector<2x16xf32>
    %179 = vector.extract_strided_slice %165 {offsets = [0, 3], sizes = [2, 1], strides = [1, 1]} : vector<2x4xf32> to vector<2x1xf32>
    %180 = vector.broadcast %179 : vector<2x1xf32> to vector<2x16xf32>
    %181 = arith.mulf %180, %19 : vector<2x16xf32>
    %182 = arith.addf %172, %175 : vector<2x16xf32>
    %183 = arith.addf %178, %181 : vector<2x16xf32>
    %184 = arith.addf %182, %183 : vector<2x16xf32>
    %185 = arith.addf %169, %184 : vector<2x16xf32>
    %186 = arith.mulf %185, %28 : vector<2x16xf32>
    %187 = math.tanh %186 : vector<2x16xf32>
    %188 = arith.mulf %187, %28 : vector<2x16xf32>
    %189 = arith.addf %188, %31 : vector<2x16xf32>
    %190 = vector.extract_strided_slice %189 {offsets = [0, 0], sizes = [2, 4], strides = [1, 1]} : vector<2x16xf32> to vector<2x4xf32>
    %191 = vector.extract_strided_slice %189 {offsets = [0, 4], sizes = [2, 4], strides = [1, 1]} : vector<2x16xf32> to vector<2x4xf32>
    %192 = vector.extract_strided_slice %189 {offsets = [0, 8], sizes = [2, 4], strides = [1, 1]} : vector<2x16xf32> to vector<2x4xf32>
    %193 = vector.extract_strided_slice %189 {offsets = [0, 12], sizes = [2, 4], strides = [1, 1]} : vector<2x16xf32> to vector<2x4xf32>
    %194 = arith.mulf %191, %163 : vector<2x4xf32>
    %195 = arith.mulf %190, %192 : vector<2x4xf32>
    %196 = arith.addf %194, %195 : vector<2x4xf32>
    %197 = math.tanh %196 : vector<2x4xf32>
    %198 = arith.mulf %193, %197 : vector<2x4xf32>
    %199 = vector.extract_strided_slice %0 {offsets = [0, 5], sizes = [2, 1], strides = [1, 1]} : vector<2x8xf32> to vector<2x1xf32>
    %200 = vector.broadcast %199 : vector<2x1xf32> to vector<2x16xf32>
    %201 = arith.mulf %200, %3 : vector<2x16xf32>
    %202 = arith.addf %201, %6 : vector<2x16xf32>
    %203 = vector.extract_strided_slice %198 {offsets = [0, 0], sizes = [2, 1], strides = [1, 1]} : vector<2x4xf32> to vector<2x1xf32>
    %204 = vector.broadcast %203 : vector<2x1xf32> to vector<2x16xf32>
    %205 = arith.mulf %204, %10 : vector<2x16xf32>
    %206 = vector.extract_strided_slice %198 {offsets = [0, 1], sizes = [2, 1], strides = [1, 1]} : vector<2x4xf32> to vector<2x1xf32>
    %207 = vector.broadcast %206 : vector<2x1xf32> to vector<2x16xf32>
    %208 = arith.mulf %207, %13 : vector<2x16xf32>
    %209 = vector.extract_strided_slice %198 {offsets = [0, 2], sizes = [2, 1], strides = [1, 1]} : vector<2x4xf32> to vector<2x1xf32>
    %210 = vector.broadcast %209 : vector<2x1xf32> to vector<2x16xf32>
    %211 = arith.mulf %210, %16 : vector<2x16xf32>
    %212 = vector.extract_strided_slice %198 {offsets = [0, 3], sizes = [2, 1], strides = [1, 1]} : vector<2x4xf32> to vector<2x1xf32>
    %213 = vector.broadcast %212 : vector<2x1xf32> to vector<2x16xf32>
    %214 = arith.mulf %213, %19 : vector<2x16xf32>
    %215 = arith.addf %205, %208 : vector<2x16xf32>
    %216 = arith.addf %211, %214 : vector<2x16xf32>
    %217 = arith.addf %215, %216 : vector<2x16xf32>
    %218 = arith.addf %202, %217 : vector<2x16xf32>
    %219 = arith.mulf %218, %28 : vector<2x16xf32>
    %220 = math.tanh %219 : vector<2x16xf32>
    %221 = arith.mulf %220, %28 : vector<2x16xf32>
    %222 = arith.addf %221, %31 : vector<2x16xf32>
    %223 = vector.extract_strided_slice %222 {offsets = [0, 0], sizes = [2, 4], strides = [1, 1]} : vector<2x16xf32> to vector<2x4xf32>
    %224 = vector.extract_strided_slice %222 {offsets = [0, 4], sizes = [2, 4], strides = [1, 1]} : vector<2x16xf32> to vector<2x4xf32>
    %225 = vector.extract_strided_slice %222 {offsets = [0, 8], sizes = [2, 4], strides = [1, 1]} : vector<2x16xf32> to vector<2x4xf32>
    %226 = vector.extract_strided_slice %222 {offsets = [0, 12], sizes = [2, 4], strides = [1, 1]} : vector<2x16xf32> to vector<2x4xf32>
    %227 = arith.mulf %224, %196 : vector<2x4xf32>
    %228 = arith.mulf %223, %225 : vector<2x4xf32>
    %229 = arith.addf %227, %228 : vector<2x4xf32>
    %230 = math.tanh %229 : vector<2x4xf32>
    %231 = arith.mulf %226, %230 : vector<2x4xf32>
    %232 = vector.extract_strided_slice %0 {offsets = [0, 6], sizes = [2, 1], strides = [1, 1]} : vector<2x8xf32> to vector<2x1xf32>
    %233 = vector.broadcast %232 : vector<2x1xf32> to vector<2x16xf32>
    %234 = arith.mulf %233, %3 : vector<2x16xf32>
    %235 = arith.addf %234, %6 : vector<2x16xf32>
    %236 = vector.extract_strided_slice %231 {offsets = [0, 0], sizes = [2, 1], strides = [1, 1]} : vector<2x4xf32> to vector<2x1xf32>
    %237 = vector.broadcast %236 : vector<2x1xf32> to vector<2x16xf32>
    %238 = arith.mulf %237, %10 : vector<2x16xf32>
    %239 = vector.extract_strided_slice %231 {offsets = [0, 1], sizes = [2, 1], strides = [1, 1]} : vector<2x4xf32> to vector<2x1xf32>
    %240 = vector.broadcast %239 : vector<2x1xf32> to vector<2x16xf32>
    %241 = arith.mulf %240, %13 : vector<2x16xf32>
    %242 = vector.extract_strided_slice %231 {offsets = [0, 2], sizes = [2, 1], strides = [1, 1]} : vector<2x4xf32> to vector<2x1xf32>
    %243 = vector.broadcast %242 : vector<2x1xf32> to vector<2x16xf32>
    %244 = arith.mulf %243, %16 : vector<2x16xf32>
    %245 = vector.extract_strided_slice %231 {offsets = [0, 3], sizes = [2, 1], strides = [1, 1]} : vector<2x4xf32> to vector<2x1xf32>
    %246 = vector.broadcast %245 : vector<2x1xf32> to vector<2x16xf32>
    %247 = arith.mulf %246, %19 : vector<2x16xf32>
    %248 = arith.addf %238, %241 : vector<2x16xf32>
    %249 = arith.addf %244, %247 : vector<2x16xf32>
    %250 = arith.addf %248, %249 : vector<2x16xf32>
    %251 = arith.addf %235, %250 : vector<2x16xf32>
    %252 = arith.mulf %251, %28 : vector<2x16xf32>
    %253 = math.tanh %252 : vector<2x16xf32>
    %254 = arith.mulf %253, %28 : vector<2x16xf32>
    %255 = arith.addf %254, %31 : vector<2x16xf32>
    %256 = vector.extract_strided_slice %255 {offsets = [0, 0], sizes = [2, 4], strides = [1, 1]} : vector<2x16xf32> to vector<2x4xf32>
    %257 = vector.extract_strided_slice %255 {offsets = [0, 4], sizes = [2, 4], strides = [1, 1]} : vector<2x16xf32> to vector<2x4xf32>
    %258 = vector.extract_strided_slice %255 {offsets = [0, 8], sizes = [2, 4], strides = [1, 1]} : vector<2x16xf32> to vector<2x4xf32>
    %259 = vector.extract_strided_slice %255 {offsets = [0, 12], sizes = [2, 4], strides = [1, 1]} : vector<2x16xf32> to vector<2x4xf32>
    %260 = arith.mulf %257, %229 : vector<2x4xf32>
    %261 = arith.mulf %256, %258 : vector<2x4xf32>
    %262 = arith.addf %260, %261 : vector<2x4xf32>
    %263 = math.tanh %262 : vector<2x4xf32>
    %264 = arith.mulf %259, %263 : vector<2x4xf32>
    %265 = vector.extract_strided_slice %0 {offsets = [0, 7], sizes = [2, 1], strides = [1, 1]} : vector<2x8xf32> to vector<2x1xf32>
    %266 = vector.broadcast %265 : vector<2x1xf32> to vector<2x16xf32>
    %267 = arith.mulf %266, %3 : vector<2x16xf32>
    %268 = arith.addf %267, %6 : vector<2x16xf32>
    %269 = vector.extract_strided_slice %264 {offsets = [0, 0], sizes = [2, 1], strides = [1, 1]} : vector<2x4xf32> to vector<2x1xf32>
    %270 = vector.broadcast %269 : vector<2x1xf32> to vector<2x16xf32>
    %271 = arith.mulf %270, %10 : vector<2x16xf32>
    %272 = vector.extract_strided_slice %264 {offsets = [0, 1], sizes = [2, 1], strides = [1, 1]} : vector<2x4xf32> to vector<2x1xf32>
    %273 = vector.broadcast %272 : vector<2x1xf32> to vector<2x16xf32>
    %274 = arith.mulf %273, %13 : vector<2x16xf32>
    %275 = vector.extract_strided_slice %264 {offsets = [0, 2], sizes = [2, 1], strides = [1, 1]} : vector<2x4xf32> to vector<2x1xf32>
    %276 = vector.broadcast %275 : vector<2x1xf32> to vector<2x16xf32>
    %277 = arith.mulf %276, %16 : vector<2x16xf32>
    %278 = vector.extract_strided_slice %264 {offsets = [0, 3], sizes = [2, 1], strides = [1, 1]} : vector<2x4xf32> to vector<2x1xf32>
    %279 = vector.broadcast %278 : vector<2x1xf32> to vector<2x16xf32>
    %280 = arith.mulf %279, %19 : vector<2x16xf32>
    %281 = arith.addf %271, %274 : vector<2x16xf32>
    %282 = arith.addf %277, %280 : vector<2x16xf32>
    %283 = arith.addf %281, %282 : vector<2x16xf32>
    %284 = arith.addf %268, %283 : vector<2x16xf32>
    %285 = arith.mulf %284, %28 : vector<2x16xf32>
    %286 = math.tanh %285 : vector<2x16xf32>
    %287 = arith.mulf %286, %28 : vector<2x16xf32>
    %288 = arith.addf %287, %31 : vector<2x16xf32>
    %289 = vector.extract_strided_slice %288 {offsets = [0, 0], sizes = [2, 4], strides = [1, 1]} : vector<2x16xf32> to vector<2x4xf32>
    %290 = vector.extract_strided_slice %288 {offsets = [0, 4], sizes = [2, 4], strides = [1, 1]} : vector<2x16xf32> to vector<2x4xf32>
    %291 = vector.extract_strided_slice %288 {offsets = [0, 8], sizes = [2, 4], strides = [1, 1]} : vector<2x16xf32> to vector<2x4xf32>
    %292 = vector.extract_strided_slice %288 {offsets = [0, 12], sizes = [2, 4], strides = [1, 1]} : vector<2x16xf32> to vector<2x4xf32>
    %293 = arith.mulf %290, %262 : vector<2x4xf32>
    %294 = arith.mulf %289, %291 : vector<2x4xf32>
    %295 = arith.addf %293, %294 : vector<2x4xf32>
    %296 = math.tanh %295 : vector<2x4xf32>
    %297 = arith.mulf %292, %296 : vector<2x4xf32>
    %c0_12 = arith.constant 0 : index
    %c0_13 = arith.constant 0 : index
    %298 = vector.load %arg4[%c0_12, %c0_13] : memref<1x4xf32, #tpu.memory_space<vmem>>, vector<1x4xf32>
    %299 = vector.broadcast %298 : vector<1x4xf32> to vector<2x4xf32>
    %300 = arith.mulf %297, %299 : vector<2x4xf32>
    %cst_14 = arith.constant dense<0.000000e+00> : vector<2xf32>
    %301 = vector.multi_reduction <add>, %300, %cst_14 [1] : vector<2x4xf32> to vector<2xf32>
    %302 = vector.shape_cast %301 : vector<2xf32> to vector<2x1xf32>
    %c0_15 = arith.constant 0 : index
    %c0_16 = arith.constant 0 : index
    %303 = vector.load %arg5[%c0_15, %c0_16] : memref<1x1xf32, #tpu.memory_space<vmem>>, vector<1x1xf32>
    %304 = vector.broadcast %303 : vector<1x1xf32> to vector<2x1xf32>
    %305 = arith.addf %302, %304 : vector<2x1xf32>
    %306 = vector.shape_cast %305 : vector<2x1xf32> to vector<2x1xf32>
    %307 = vector.broadcast %306 : vector<2x1xf32> to vector<2x128xf32>
    %c0_17 = arith.constant 0 : index
    %c0_18 = arith.constant 0 : index
    %308 = vector.load %arg6[%c0_17, %c0_18] : memref<2x128xf32, #tpu.memory_space<vmem>>, vector<2x128xf32>
    tpu.vector_store %arg6[%c0_17, %c0_18], %307 {strides = array<i32>} : memref<2x128xf32, #tpu.memory_space<vmem>>, vector<2x128xf32>,
    return
  }
}

</mosaic_0001>

<bundles_post_ra>
// kernel: tpu_custom_call.1
= control target key start
LH: loop header
LB: loop body
LE: loop exit
PB: predicated region body
PF: predicated region fallthrough
CT: control target
= control target key end

     0   :  { %s891_s0 = inlined_call_operand.hbm [shape: f32[2,8], index: 0, kind: input, shape index: {}]   ;;  %s892_s1 = inlined_call_operand.vmem [shape: f32[1,16], index: 1, kind: input, shape index: {}]   ;;  %s893_s2 = inlined_call_operand.vmem [shape: f32[4,16], index: 2, kind: input, shape index: {}]   ;;  %s894_s3 = inlined_call_operand.vmem [shape: f32[1,16], index: 3, kind: input, shape index: {}]   ;;  %s895_s4 = inlined_call_operand.vmem [shape: f32[1,4], index: 4, kind: input, shape index: {}]   ;;  %s896_s5 = inlined_call_operand.<no memory space> [shape: f32[1,1], index: 5, kind: input, shape index: {}]   ;;  %s897_s6 = inlined_call_operand.hbm [shape: f32[2,128], index: 6, kind: output, shape index: {}]  }
   0x1   :  { %v11_v0 = vstv %s896_s5 }
   0x2   :  { %12 = vst [vmem:[#allocation2] sm:$0x1] %v11_v0 }
   0x3   :  { %13 = vsyncpa [#allocation4], 0 }
   0x4   :  { %14 = vsyncpa [#allocation5], 0  ;;  %s662_s23 = smov [#allocation3]  }
   0x5   :  { %s21_s24 = sshll.u32 %s662_s23, 4  ;;  %s22_s24 = int_to_ptr.vmem [resolvable:$true] %s21_s24 }
   0x6   :  { %s626_s25 = scalar_lea.vmem %s22_s24, 32  ;;  %p631_p1 = scmp.lt.s32.totalorder %s22_s24, %s22_s24 }
   0x7   :  { %p627_p0 = scmp.ne.s32.totalorder %s22_s24, %s626_s25  ;;  %p632_p2 = scmp.lt.s32.totalorder %s626_s25, %s626_s25 }
   0x9   :  { %p633_p3 = por %p632_p2, %p631_p1 }
   0xb   :  { %p634_p4 = pnand %p633_p3, %p627_p0 }
   0xd   :  { %637 = shalt.err (!%p634_p4)
}
   0xe   :  { %24 = dma.hbm_to_vmem [thread:$0]  %s891_s0, 32, %s22_s24, [#allocation4]  }
   0xf   :  { %658 = dma.done.wait [#allocation4], 32  }
  0x10   :  { %659 = vsyncadd [#allocation4], 4294967264  ;;  %v663_v1 = vmov 0   ;;  %v724_v2 = vld [vmem:[#allocation3] sm:$0x3]  ;;  %v54_v3 = vlaneseq  ;;  %v664_v27 = vmov 0.5  }
  0x11   :  { %548 = vset.pattern.permute.xlu0 %v663_v1  ;;  %v53_v9 = vld [vmem:[%s893_s2] sm:$0xf]  ;;  %v667_v40 = vmov 13   ;;  %v668_v41 = vmov 12   ;;  %s669_s7 = smov 8   ;;  %v670_v45 = vmov 14  }
  0x12   :  { %79 = vperm.xlu0 %548, %v724_v2   ;;  %v55_v4 = vshrl.u32 %v54_v3, 7  ;;  %v71_v18 = vand.u32 127, %v54_v3  ;;  %v745_v21 = vld [vmem:[%s892_s1] ss:$0 sm:$0xff]  ;;  %s665_s1 = smov 120   ;;  %550 = vset.pattern.permute.xlu1 %v667_v40  ;;  %v671_v46 = vmov 15  }
  0x13   :  { %v750_v22 = vld [vmem:[%s894_s3] ss:$0 sm:$0xff]  ;;  %s666_s3 = smov 4   ;;  %v672_v47 = vmov 1   ;;  %s679_s10 = smov 12   ;;  %vm491_vm3 = vcmask 25600  }
  0x14   :  { %v56_v5 = vsub.s32 0, %v55_v4  ;;  %v60_v6 = vsub.s32 1, %v55_v4  ;;  %v64_v7 = vsub.s32 2, %v55_v4  ;;  %v68_v8 = vsub.s32 3, %v55_v4  ;;  %s680_s11 = smov 116  }
  0x15   :  { %vm72_vm0 = vcmp.ge.s32.totalorder %v71_v18, 8  ;;  %vm73_vm1 = vcmp.lt.s32.totalorder %v71_v18, 12 }
  0x16   :  { %v730_v10 = vrot.slane %v53_v9, %v56_v5  ;;  %v732_v11 = vrot.slane %v53_v9, %v60_v6  ;;  %v734_v12 = vrot.slane %v53_v9, %v64_v7  ;;  %v736_v13 = vrot.slane %v53_v9, %v68_v8  ;;  %vm74_vm2 = vmand %vm72_vm0, %vm73_vm1  ;;  %549 = vset.pattern.permute.xlu0 %v668_v41 }
  0x17   :  { %v754_v28 = vsel %vm74_vm2, 1.0, %v664_v27  ;;  %v757_v32 = vsel %vm74_vm2, 0.0, %v664_v27 }
  0x18   :  { %v84_v14 = vmul.f32 0.0, %v730_v10  ;;  %v85_v15 = vmul.f32 0.0, %v732_v11  ;;  %v86_v16 = vmul.f32 0.0, %v734_v12  ;;  %v87_v17 = vmul.f32 0.0, %v736_v13 }
  0x1a   :  { %v88_v19 = vadd.f32 %v85_v15, %v84_v14  ;;  %v89_v20 = vadd.f32 %v87_v17, %v86_v16  ;;  %v673_v17 = vmov 2  }
  0x1c   :  { %v90_v24 = vadd.f32 %v89_v20, %v88_v19 }
  0x8d   :  { %v80_v23 = vpop.permute.xlu0 %79 }
  0x8e   :  { %v82_v25 = vmul.f32 %v745_v21, %v80_v23 }
  0x90   :  { %v83_v26 = vadd.f32 %v750_v22, %v82_v25 }
  0x92   :  { %v91_v29 = vadd.f32 %v90_v24, %v83_v26 }
  0x94   :  { %v92_v30 = vmul.f32 %v91_v29, %v754_v28 }
  0x96   :  { %586 = vtanh.f32 %v92_v30 }
  0xa3   :  { %v587_v31 = vpop.eup %586 }
  0xa4   :  { %v94_v33 = vmul.f32 %v587_v31, %v754_v28 }
  0xa6   :  { %v95_v34 = vadd.f32 %v94_v33, %v757_v32 }
  0xa8   :  { %98 = vrot.lane.b32.xlu0 %v95_v34, %s665_s1  ;;  %v96_v37 = vmul.f32 0.0, %v95_v34 }
 0x11a   :  { %v99_v35 = vpop.permute.xlu0 %98 }
 0x11b   :  { %v101_v36 = vmul.f32 %v99_v35, %v95_v34 }
 0x11d   :  { %103 = vrot.lane.b32.xlu1 %v101_v36, %s666_s3 }
 0x18f   :  { %v104_v38 = vpop.permute.xlu1 %103 }
 0x190   :  { %v106_v39 = vadd.f32 %v104_v38, %v96_v37 }
 0x192   :  { %588 = vtanh.f32 %v106_v39 }
 0x19f   :  { %v589_v42 = vpop.eup %588 }
 0x1a0   :  { %109 = vrot.lane.b32.xlu1 %v589_v42, %s669_s7 }
 0x212   :  { %v110_v43 = vpop.permute.xlu1 %109 }
 0x213   :  { %v112_v44 = vmul.f32 %v110_v43, %v95_v34 }
 0x215   :  { %126 = vperm.xlu1 %550, %v112_v44   ;;  %121 = vperm.xlu0 %549, %v112_v44  }
 0x219   :  { %551 = vset.pattern.permute.xlu1 %v670_v45  ;;  %552 = vset.pattern.permute.xlu0 %v671_v46 }
 0x21a   :  { %131 = vperm.xlu1 %551, %v112_v44   ;;  %136 = vperm.xlu0 %552, %v112_v44  }
 0x21e   :  { %553 = vset.pattern.permute.xlu1 %v672_v47  ;;  %554 = vset.pattern.permute.xlu0 %v668_v41 }
 0x21f   :  { %114 = vperm.xlu1 %553, %v724_v2  }
 0x223   :  { %555 = vset.pattern.permute.xlu1 %v667_v40 }
 0x290   :  { %v127_v48 = vpop.permute.xlu1 %126  ;;  %v122_v49 = vpop.permute.xlu0 %121 }
 0x291   :  { %v129_v54 = vmul.f32 %v127_v48, %v732_v11  ;;  %v124_v55 = vmul.f32 %v122_v49, %v730_v10 }
 0x293   :  { %v140_v58 = vadd.f32 %v129_v54, %v124_v55 }
 0x295   :  { %v132_v50 = vpop.permute.xlu1 %131  ;;  %v137_v51 = vpop.permute.xlu0 %136 }
 0x296   :  { %v134_v52 = vmul.f32 %v132_v50, %v734_v12  ;;  %v139_v53 = vmul.f32 %v137_v51, %v736_v13 }
 0x298   :  { %v141_v56 = vadd.f32 %v139_v53, %v134_v52  ;;  %v674_v53 = vmov 3  }
 0x29a   :  { %v115_v57 = vpop.permute.xlu1 %114  ;;  %v142_v60 = vadd.f32 %v141_v56, %v140_v58 }
 0x29b   :  { %v117_v59 = vmul.f32 %v745_v21, %v115_v57 }
 0x29d   :  { %v118_v61 = vadd.f32 %v750_v22, %v117_v59 }
 0x29f   :  { %v143_v62 = vadd.f32 %v142_v60, %v118_v61 }
 0x2a1   :  { %v144_v63 = vmul.f32 %v143_v62, %v754_v28 }
 0x2a3   :  { %590 = vtanh.f32 %v144_v63 }
 0x2b0   :  { %v591_v0 = vpop.eup %590 }
 0x2b1   :  { %v146_v3 = vmul.f32 %v591_v0, %v754_v28 }
 0x2b3   :  { %v147_v4 = vadd.f32 %v146_v3, %v757_v32 }
 0x2b5   :  { %150 = vrot.lane.b32.xlu1 %v147_v4, %s665_s1  ;;  %v148_v7 = vmul.f32 %v147_v4, %v106_v39 }
 0x327   :  { %v151_v5 = vpop.permute.xlu1 %150 }
 0x328   :  { %v153_v6 = vmul.f32 %v151_v5, %v147_v4 }
 0x32a   :  { %155 = vrot.lane.b32.xlu0 %v153_v6, %s666_s3 }
 0x39c   :  { %v156_v8 = vpop.permute.xlu0 %155 }
 0x39d   :  { %v158_v9 = vadd.f32 %v156_v8, %v148_v7 }
 0x39f   :  { %592 = vtanh.f32 %v158_v9 }
 0x3ac   :  { %v593_v14 = vpop.eup %592 }
 0x3ad   :  { %161 = vrot.lane.b32.xlu1 %v593_v14, %s669_s7 }
 0x41f   :  { %v162_v15 = vpop.permute.xlu1 %161 }
 0x420   :  { %v164_v16 = vmul.f32 %v162_v15, %v147_v4 }
 0x422   :  { %178 = vperm.xlu1 %555, %v164_v16   ;;  %173 = vperm.xlu0 %554, %v164_v16  }
 0x426   :  { %556 = vset.pattern.permute.xlu1 %v670_v45  ;;  %557 = vset.pattern.permute.xlu0 %v671_v46 }
 0x427   :  { %183 = vperm.xlu1 %556, %v164_v16   ;;  %188 = vperm.xlu0 %557, %v164_v16  }
 0x42b   :  { %558 = vset.pattern.permute.xlu1 %v673_v17  ;;  %559 = vset.pattern.permute.xlu0 %v668_v41 }
 0x42c   :  { %166 = vperm.xlu1 %558, %v724_v2  }
 0x430   :  { %560 = vset.pattern.permute.xlu1 %v667_v40 }
 0x49d   :  { %v179_v18 = vpop.permute.xlu1 %178  ;;  %v174_v19 = vpop.permute.xlu0 %173 }
 0x49e   :  { %v181_v26 = vmul.f32 %v179_v18, %v732_v11  ;;  %v176_v27 = vmul.f32 %v174_v19, %v730_v10 }
 0x4a0   :  { %v192_v31 = vadd.f32 %v181_v26, %v176_v27 }
 0x4a2   :  { %v184_v20 = vpop.permute.xlu1 %183  ;;  %v189_v23 = vpop.permute.xlu0 %188 }
 0x4a3   :  { %v186_v24 = vmul.f32 %v184_v20, %v734_v12  ;;  %v191_v25 = vmul.f32 %v189_v23, %v736_v13 }
 0x4a5   :  { %v193_v29 = vadd.f32 %v191_v25, %v186_v24  ;;  %v675_v25 = vmov 4  }
 0x4a7   :  { %v167_v30 = vpop.permute.xlu1 %166  ;;  %v194_v34 = vadd.f32 %v193_v29, %v192_v31 }
 0x4a8   :  { %v169_v33 = vmul.f32 %v745_v21, %v167_v30 }
 0x4aa   :  { %v170_v35 = vadd.f32 %v750_v22, %v169_v33 }
 0x4ac   :  { %v195_v36 = vadd.f32 %v194_v34, %v170_v35 }
 0x4ae   :  { %v196_v37 = vmul.f32 %v195_v36, %v754_v28 }
 0x4b0   :  { %594 = vtanh.f32 %v196_v37 }
 0x4bd   :  { %v595_v38 = vpop.eup %594 }
 0x4be   :  { %v198_v39 = vmul.f32 %v595_v38, %v754_v28 }
 0x4c0   :  { %v199_v42 = vadd.f32 %v198_v39, %v757_v32 }
 0x4c2   :  { %202 = vrot.lane.b32.xlu1 %v199_v42, %s665_s1  ;;  %v200_v47 = vmul.f32 %v199_v42, %v158_v9 }
 0x534   :  { %v203_v43 = vpop.permute.xlu1 %202 }
 0x535   :  { %v205_v44 = vmul.f32 %v203_v43, %v199_v42 }
 0x537   :  { %207 = vrot.lane.b32.xlu0 %v205_v44, %s666_s3 }
 0x5a9   :  { %v208_v48 = vpop.permute.xlu0 %207 }
 0x5aa   :  { %v210_v49 = vadd.f32 %v208_v48, %v200_v47 }
 0x5ac   :  { %596 = vtanh.f32 %v210_v49 }
 0x5b9   :  { %v597_v50 = vpop.eup %596 }
 0x5ba   :  { %213 = vrot.lane.b32.xlu1 %v597_v50, %s669_s7 }
 0x62c   :  { %v214_v51 = vpop.permute.xlu1 %213 }
 0x62d   :  { %v216_v52 = vmul.f32 %v214_v51, %v199_v42 }
 0x62f   :  { %230 = vperm.xlu1 %560, %v216_v52   ;;  %225 = vperm.xlu0 %559, %v216_v52  }
 0x633   :  { %561 = vset.pattern.permute.xlu1 %v670_v45  ;;  %562 = vset.pattern.permute.xlu0 %v671_v46 }
 0x634   :  { %235 = vperm.xlu1 %561, %v216_v52   ;;  %240 = vperm.xlu0 %562, %v216_v52  }
 0x638   :  { %563 = vset.pattern.permute.xlu1 %v674_v53  ;;  %564 = vset.pattern.permute.xlu0 %v668_v41 }
 0x639   :  { %218 = vperm.xlu1 %563, %v724_v2  }
 0x63d   :  { %565 = vset.pattern.permute.xlu1 %v667_v40 }
 0x6aa   :  { %v231_v54 = vpop.permute.xlu1 %230  ;;  %v226_v55 = vpop.permute.xlu0 %225 }
 0x6ab   :  { %v233_v60 = vmul.f32 %v231_v54, %v732_v11  ;;  %v228_v61 = vmul.f32 %v226_v55, %v730_v10 }
 0x6ad   :  { %v244_v0 = vadd.f32 %v233_v60, %v228_v61 }
 0x6af   :  { %v236_v56 = vpop.permute.xlu1 %235  ;;  %v241_v57 = vpop.permute.xlu0 %240 }
 0x6b0   :  { %v238_v58 = vmul.f32 %v236_v56, %v734_v12  ;;  %v243_v59 = vmul.f32 %v241_v57, %v736_v13 }
 0x6b2   :  { %v245_v62 = vadd.f32 %v243_v59, %v238_v58  ;;  %v676_v59 = vmov 5  }
 0x6b4   :  { %v219_v63 = vpop.permute.xlu1 %218  ;;  %v246_v4 = vadd.f32 %v245_v62, %v244_v0 }
 0x6b5   :  { %v221_v3 = vmul.f32 %v745_v21, %v219_v63 }
 0x6b7   :  { %v222_v5 = vadd.f32 %v750_v22, %v221_v3 }
 0x6b9   :  { %v247_v6 = vadd.f32 %v246_v4, %v222_v5 }
 0x6bb   :  { %v248_v7 = vmul.f32 %v247_v6, %v754_v28 }
 0x6bd   :  { %598 = vtanh.f32 %v248_v7 }
 0x6ca   :  { %v599_v8 = vpop.eup %598 }
 0x6cb   :  { %v250_v9 = vmul.f32 %v599_v8, %v754_v28 }
 0x6cd   :  { %v251_v14 = vadd.f32 %v250_v9, %v757_v32 }
 0x6cf   :  { %254 = vrot.lane.b32.xlu1 %v251_v14, %s665_s1  ;;  %v252_v17 = vmul.f32 %v251_v14, %v210_v49 }
 0x741   :  { %v255_v15 = vpop.permute.xlu1 %254 }
 0x742   :  { %v257_v16 = vmul.f32 %v255_v15, %v251_v14 }
 0x744   :  { %259 = vrot.lane.b32.xlu0 %v257_v16, %s666_s3 }
 0x7b6   :  { %v260_v18 = vpop.permute.xlu0 %259 }
 0x7b7   :  { %v262_v19 = vadd.f32 %v260_v18, %v252_v17 }
 0x7b9   :  { %600 = vtanh.f32 %v262_v19 }
 0x7c6   :  { %v601_v20 = vpop.eup %600 }
 0x7c7   :  { %265 = vrot.lane.b32.xlu1 %v601_v20, %s669_s7 }
 0x839   :  { %v266_v23 = vpop.permute.xlu1 %265 }
 0x83a   :  { %v268_v24 = vmul.f32 %v266_v23, %v251_v14 }
 0x83c   :  { %282 = vperm.xlu1 %565, %v268_v24   ;;  %277 = vperm.xlu0 %564, %v268_v24  }
 0x840   :  { %566 = vset.pattern.permute.xlu1 %v670_v45  ;;  %567 = vset.pattern.permute.xlu0 %v671_v46 }
 0x841   :  { %287 = vperm.xlu1 %566, %v268_v24   ;;  %292 = vperm.xlu0 %567, %v268_v24  }
 0x845   :  { %568 = vset.pattern.permute.xlu1 %v675_v25  ;;  %569 = vset.pattern.permute.xlu0 %v668_v41 }
 0x846   :  { %270 = vperm.xlu1 %568, %v724_v2  }
 0x84a   :  { %570 = vset.pattern.permute.xlu1 %v667_v40 }
 0x8b7   :  { %v283_v26 = vpop.permute.xlu1 %282  ;;  %v278_v27 = vpop.permute.xlu0 %277 }
 0x8b8   :  { %v285_v34 = vmul.f32 %v283_v26, %v732_v11  ;;  %v280_v35 = vmul.f32 %v278_v27, %v730_v10 }
 0x8ba   :  { %v296_v38 = vadd.f32 %v285_v34, %v280_v35 }
 0x8bc   :  { %v288_v29 = vpop.permute.xlu1 %287  ;;  %v293_v30 = vpop.permute.xlu0 %292 }
 0x8bd   :  { %v290_v31 = vmul.f32 %v288_v29, %v734_v12  ;;  %v295_v33 = vmul.f32 %v293_v30, %v736_v13 }
 0x8bf   :  { %v297_v36 = vadd.f32 %v295_v33, %v290_v31  ;;  %v677_v33 = vmov 6  }
 0x8c1   :  { %v271_v37 = vpop.permute.xlu1 %270  ;;  %v298_v42 = vadd.f32 %v297_v36, %v296_v38 }
 0x8c2   :  { %v273_v39 = vmul.f32 %v745_v21, %v271_v37 }
 0x8c4   :  { %v274_v43 = vadd.f32 %v750_v22, %v273_v39 }
 0x8c6   :  { %v299_v44 = vadd.f32 %v298_v42, %v274_v43 }
 0x8c8   :  { %v300_v47 = vmul.f32 %v299_v44, %v754_v28 }
 0x8ca   :  { %602 = vtanh.f32 %v300_v47 }
 0x8d7   :  { %v603_v48 = vpop.eup %602 }
 0x8d8   :  { %v302_v49 = vmul.f32 %v603_v48, %v754_v28 }
 0x8da   :  { %v303_v50 = vadd.f32 %v302_v49, %v757_v32 }
 0x8dc   :  { %306 = vrot.lane.b32.xlu1 %v303_v50, %s665_s1  ;;  %v304_v53 = vmul.f32 %v303_v50, %v262_v19 }
 0x94e   :  { %v307_v51 = vpop.permute.xlu1 %306 }
 0x94f   :  { %v309_v52 = vmul.f32 %v307_v51, %v303_v50 }
 0x951   :  { %311 = vrot.lane.b32.xlu0 %v309_v52, %s666_s3 }
 0x9c3   :  { %v312_v54 = vpop.permute.xlu0 %311 }
 0x9c4   :  { %v314_v55 = vadd.f32 %v312_v54, %v304_v53 }
 0x9c6   :  { %604 = vtanh.f32 %v314_v55 }
 0x9d3   :  { %v605_v56 = vpop.eup %604 }
 0x9d4   :  { %317 = vrot.lane.b32.xlu1 %v605_v56, %s669_s7 }
 0xa46   :  { %v318_v57 = vpop.permute.xlu1 %317 }
 0xa47   :  { %v320_v58 = vmul.f32 %v318_v57, %v303_v50 }
 0xa49   :  { %334 = vperm.xlu1 %570, %v320_v58   ;;  %329 = vperm.xlu0 %569, %v320_v58  }
 0xa4d   :  { %571 = vset.pattern.permute.xlu1 %v670_v45  ;;  %572 = vset.pattern.permute.xlu0 %v671_v46 }
 0xa4e   :  { %339 = vperm.xlu1 %571, %v320_v58   ;;  %344 = vperm.xlu0 %572, %v320_v58  }
 0xa52   :  { %573 = vset.pattern.permute.xlu1 %v676_v59  ;;  %574 = vset.pattern.permute.xlu0 %v668_v41 }
 0xa53   :  { %322 = vperm.xlu1 %573, %v724_v2  }
 0xa57   :  { %575 = vset.pattern.permute.xlu1 %v667_v40 }
 0xac4   :  { %v335_v60 = vpop.permute.xlu1 %334  ;;  %v330_v61 = vpop.permute.xlu0 %329 }
 0xac5   :  { %v337_v4 = vmul.f32 %v335_v60, %v732_v11  ;;  %v332_v5 = vmul.f32 %v330_v61, %v730_v10 }
 0xac7   :  { %v348_v8 = vadd.f32 %v337_v4, %v332_v5 }
 0xac9   :  { %v340_v62 = vpop.permute.xlu1 %339  ;;  %v345_v63 = vpop.permute.xlu0 %344 }
 0xaca   :  { %v342_v0 = vmul.f32 %v340_v62, %v734_v12  ;;  %v347_v3 = vmul.f32 %v345_v63, %v736_v13  ;;  %v678_v63 = vmov 7  }
 0xacc   :  { %v349_v6 = vadd.f32 %v347_v3, %v342_v0 }
 0xace   :  { %v323_v7 = vpop.permute.xlu1 %322  ;;  %v350_v14 = vadd.f32 %v349_v6, %v348_v8 }
 0xacf   :  { %v325_v9 = vmul.f32 %v745_v21, %v323_v7 }
 0xad1   :  { %v326_v15 = vadd.f32 %v750_v22, %v325_v9 }
 0xad3   :  { %v351_v16 = vadd.f32 %v350_v14, %v326_v15 }
 0xad5   :  { %v352_v17 = vmul.f32 %v351_v16, %v754_v28 }
 0xad7   :  { %606 = vtanh.f32 %v352_v17 }
 0xae4   :  { %v607_v18 = vpop.eup %606 }
 0xae5   :  { %v354_v19 = vmul.f32 %v607_v18, %v754_v28 }
 0xae7   :  { %v355_v20 = vadd.f32 %v354_v19, %v757_v32 }
 0xae9   :  { %358 = vrot.lane.b32.xlu1 %v355_v20, %s665_s1  ;;  %v356_v25 = vmul.f32 %v355_v20, %v314_v55 }
 0xb5b   :  { %v359_v23 = vpop.permute.xlu1 %358 }
 0xb5c   :  { %v361_v24 = vmul.f32 %v359_v23, %v355_v20 }
 0xb5e   :  { %363 = vrot.lane.b32.xlu0 %v361_v24, %s666_s3 }
 0xbd0   :  { %v364_v26 = vpop.permute.xlu0 %363 }
 0xbd1   :  { %v366_v27 = vadd.f32 %v364_v26, %v356_v25 }
 0xbd3   :  { %608 = vtanh.f32 %v366_v27 }
 0xbe0   :  { %v609_v29 = vpop.eup %608 }
 0xbe1   :  { %369 = vrot.lane.b32.xlu1 %v609_v29, %s669_s7  ;;  %v527_v29 = vld [vmem:[#allocation2] ss:$0 sm:$0xff] }
 0xc53   :  { %v370_v30 = vpop.permute.xlu1 %369 }
 0xc54   :  { %v372_v31 = vmul.f32 %v370_v30, %v355_v20 }
 0xc56   :  { %386 = vperm.xlu1 %575, %v372_v31   ;;  %381 = vperm.xlu0 %574, %v372_v31  }
 0xc5a   :  { %576 = vset.pattern.permute.xlu1 %v670_v45  ;;  %577 = vset.pattern.permute.xlu0 %v671_v46 }
 0xc5b   :  { %391 = vperm.xlu1 %576, %v372_v31   ;;  %396 = vperm.xlu0 %577, %v372_v31  }
 0xc5f   :  { %578 = vset.pattern.permute.xlu1 %v677_v33  ;;  %579 = vset.pattern.permute.xlu0 %v668_v41 }
 0xc60   :  { %374 = vperm.xlu1 %578, %v724_v2  }
 0xc64   :  { %580 = vset.pattern.permute.xlu1 %v667_v40 }
 0xcd1   :  { %v387_v34 = vpop.permute.xlu1 %386  ;;  %v382_v35 = vpop.permute.xlu0 %381 }
 0xcd2   :  { %v389_v42 = vmul.f32 %v387_v34, %v732_v11  ;;  %v384_v43 = vmul.f32 %v382_v35, %v730_v10 }
 0xcd4   :  { %v400_v48 = vadd.f32 %v389_v42, %v384_v43 }
 0xcd6   :  { %v392_v36 = vpop.permute.xlu1 %391  ;;  %v397_v37 = vpop.permute.xlu0 %396 }
 0xcd7   :  { %v394_v38 = vmul.f32 %v392_v36, %v734_v12  ;;  %v399_v39 = vmul.f32 %v397_v37, %v736_v13 }
 0xcd9   :  { %v401_v44 = vadd.f32 %v399_v39, %v394_v38 }
 0xcdb   :  { %v375_v47 = vpop.permute.xlu1 %374  ;;  %v402_v49 = vadd.f32 %v401_v44, %v400_v48 }
 0xcdc   :  { %v377_v41 = vmul.f32 %v745_v21, %v375_v47 }
 0xcde   :  { %v378_v40 = vadd.f32 %v750_v22, %v377_v41 }
 0xce0   :  { %v403_v50 = vadd.f32 %v402_v49, %v378_v40 }
 0xce2   :  { %v404_v51 = vmul.f32 %v403_v50, %v754_v28 }
 0xce4   :  { %610 = vtanh.f32 %v404_v51 }
 0xcf1   :  { %v611_v52 = vpop.eup %610 }
 0xcf2   :  { %v406_v53 = vmul.f32 %v611_v52, %v754_v28 }
 0xcf4   :  { %v407_v54 = vadd.f32 %v406_v53, %v757_v32 }
 0xcf6   :  { %410 = vrot.lane.b32.xlu1 %v407_v54, %s665_s1  ;;  %v408_v57 = vmul.f32 %v407_v54, %v366_v27 }
 0xd68   :  { %v411_v55 = vpop.permute.xlu1 %410 }
 0xd69   :  { %v413_v56 = vmul.f32 %v411_v55, %v407_v54 }
 0xd6b   :  { %415 = vrot.lane.b32.xlu0 %v413_v56, %s666_s3 }
 0xddd   :  { %v416_v58 = vpop.permute.xlu0 %415 }
 0xdde   :  { %v418_v59 = vadd.f32 %v416_v58, %v408_v57 }
 0xde0   :  { %612 = vtanh.f32 %v418_v59 }
 0xded   :  { %v613_v60 = vpop.eup %612 }
 0xdee   :  { %421 = vrot.lane.b32.xlu1 %v613_v60, %s669_s7 }
 0xe60   :  { %v422_v61 = vpop.permute.xlu1 %421 }
 0xe61   :  { %v424_v62 = vmul.f32 %v422_v61, %v407_v54 }
 0xe63   :  { %438 = vperm.xlu1 %580, %v424_v62   ;;  %433 = vperm.xlu0 %579, %v424_v62  }
 0xe67   :  { %581 = vset.pattern.permute.xlu1 %v670_v45  ;;  %582 = vset.pattern.permute.xlu0 %v671_v46 }
 0xe68   :  { %443 = vperm.xlu1 %581, %v424_v62   ;;  %448 = vperm.xlu0 %582, %v424_v62  }
 0xe6c   :  { %583 = vset.pattern.permute.xlu1 %v678_v63  ;;  %585 = vset.pattern.permute.xlu0 %v663_v1 }
 0xe6d   :  { %426 = vperm.xlu1 %583, %v724_v2  }
 0xe71   :  { %584 = vset.pattern.permute.xlu1 %v663_v1 }
 0xede   :  { %v439_v0 = vpop.permute.xlu1 %438  ;;  %v434_v3 = vpop.permute.xlu0 %433 }
 0xedf   :  { %v441_v46 = vmul.f32 %v439_v0, %v732_v11  ;;  %v436_v7 = vmul.f32 %v434_v3, %v730_v10 }
 0xee1   :  { %v452_v14 = vadd.f32 %v441_v46, %v436_v7 }
 0xee3   :  { %v444_v4 = vpop.permute.xlu1 %443  ;;  %v449_v5 = vpop.permute.xlu0 %448 }
 0xee4   :  { %v446_v6 = vmul.f32 %v444_v4, %v734_v12  ;;  %v451_v45 = vmul.f32 %v449_v5, %v736_v13 }
 0xee6   :  { %v453_v8 = vadd.f32 %v451_v45, %v446_v6 }
 0xee8   :  { %v427_v9 = vpop.permute.xlu1 %426  ;;  %v454_v2 = vadd.f32 %v453_v8, %v452_v14 }
 0xee9   :  { %v429_v15 = vmul.f32 %v745_v21, %v427_v9  ;;  %v526_v21 = vld [vmem:[%s895_s4] ss:$0 sm:$0xff]  ;;  %s681_s4 = smov [#allocation6]  }
 0xeea   :  { %s515_s12 = sshll.u32 %s681_s4, 4  ;;  %s516_s12 = int_to_ptr.vmem [resolvable:$true] %s515_s12 }
 0xeeb   :  { %v430_v1 = vadd.f32 %v750_v22, %v429_v15  ;;  %s638_s13 = scalar_lea.vmem %s516_s12, 32  ;;  %p643_p6 = scmp.lt.s32.totalorder %s516_s12, %s516_s12 }
 0xeec   :  { %p639_p5 = scmp.ne.s32.totalorder %s516_s12, %s638_s13  ;;  %p644_p7 = scmp.lt.s32.totalorder %s638_s13, %s638_s13 }
 0xeed   :  { %v455_v16 = vadd.f32 %v454_v2, %v430_v1 }
 0xeee   :  { %p645_p8 = por %p644_p7, %p643_p6 }
 0xeef   :  { %v456_v17 = vmul.f32 %v455_v16, %v754_v28 }
 0xef0   :  { %p646_p9 = pnand %p645_p8, %p639_p5 }
 0xef1   :  { %614 = vtanh.f32 %v456_v17 }
 0xefe   :  { %v615_v18 = vpop.eup %614 }
 0xeff   :  { %v458_v12 = vmul.f32 %v615_v18, %v754_v28 }
 0xf01   :  { %v459_v13 = vadd.f32 %v458_v12, %v757_v32 }
 0xf03   :  { %462 = vrot.lane.b32.xlu1 %v459_v13, %s665_s1  ;;  %v460_v22 = vmul.f32 %v459_v13, %v418_v59 }
 0xf75   :  { %v463_v10 = vpop.permute.xlu1 %462 }
 0xf76   :  { %v465_v11 = vmul.f32 %v463_v10, %v459_v13 }
 0xf78   :  { %467 = vrot.lane.b32.xlu0 %v465_v11, %s666_s3 }
 0xf7c   :  { %483 = vrot.lane.b32.xlu0 %v526_v21, %s679_s10 }
 0xfea   :  { %v468_v19 = vpop.permute.xlu0 %467 }
 0xfeb   :  { %v470_v20 = vadd.f32 %v468_v19, %v460_v22 }
 0xfed   :  { %616 = vtanh.f32 %v470_v20 }
 0xfee   :  { %v484_v32 = vpop.permute.xlu0 %483 }
 0xffa   :  { %v617_v23 = vpop.eup %616 }
 0xffb   :  { %473 = vrot.lane.b32.xlu1 %v617_v23, %s669_s7 }
0x106d   :  { %v474_v28 = vpop.permute.xlu1 %473 }
0x106e   :  { %v476_v24 = vmul.f32 %v474_v28, %v459_v13 }
0x1070   :  { %v486_v25 = vmul.f32 %v484_v32, %v476_v24 }
0x1072   :  { %488 = vrot.lane.b32.xlu1 %v486_v25, %s680_s11 }
0x10e4   :  { %v489_v26 = vpop.permute.xlu1 %488 }
0x10e5   :  { %v492_v27 = vsel %vm491_vm3, %v489_v26, 0.0 }
0x10e6   :  { %493 = vadd.xlane.f32.xlu0 %v492_v27 }
0x116f   :  { %v494_v30 = vpop.xlane.xlu0 %493 }
0x1170   :  { %v502_v31 = vadd.f32 %v527_v29, %v494_v30 }
0x1172   :  { %505 = vperm.xlu1 %584, %v502_v31  }
0x11ed   :  { %v506_v33 = vpop.permute.xlu1 %505 }
0x11ee   :  { %508 = vst [vmem:[#allocation6] sm:$0x3] %v506_v33 }
0x11ef   :  { %649 = shalt.err (!%p646_p9)
}
0x11f0   :  { %518 = dma.vmem_to_hbm [thread:$0]  %s516_s12, 32, %s897_s6, [#allocation5]  }
0x11f1   :  { %660 = dma.done.wait [#allocation5], 32  }
0x11f2   :  { %661 = vsyncadd [#allocation5], 4294967264 }
0x11f3   :  { %522 = vsyncpa [#allocation4], 1 }
0x11f4   :  { %523 = vsyncpa [#allocation5], 1 }

</bundles_post_ra>
